<compile_context>
chip_gen: v6e
topology: v6e:2x2x1
jax: 0.10.0
libtpu: 0.0.40
codegen_flags: <defaults>
</compile_context>

<pallas_src>
import jax
import jax.numpy as jnp
from jax.experimental import pallas as pl
from jax.experimental.pallas import tpu as pltpu


# ----------------------------------------------------------------------------
# Pure flatten path: metadata-only reshape (free in XLA).  Per review feedback
# no kernel is ever launched for a plain flatten -- it is always the free view.
# ----------------------------------------------------------------------------
def flatten_features(x):
    """(B, ...) -> (B, prod(rest)) as a free, metadata-only reshape."""
    B = int(x.shape[0])
    F = 1
    for s in x.shape[1:]:
        F *= int(s)
    return jnp.reshape(x, (B, F))


# ----------------------------------------------------------------------------
# Fused Pallas kernel: flatten + first linear layer of a subclass.
# The flatten is folded in (metadata reshape at the boundary); the kernel does
# real MXU work per tile, so the HBM read of the activation slab is amortized.
# ----------------------------------------------------------------------------
def _flatten_linear_kernel(x_ref, w_ref, o_ref, acc_ref):
    k = pl.program_id(1)

    @pl.when(k == 0)
    def _():
        acc_ref[...] = jnp.zeros_like(acc_ref)

    acc_ref[...] += jnp.dot(
        x_ref[...], w_ref[...], preferred_element_type=jnp.float32
    )

    @pl.when(k == pl.num_programs(1) - 1)
    def _():
        o_ref[...] = acc_ref[...].astype(o_ref.dtype)


def flatten_linear_pallas(x, w, *, block_bytes_max=2 * 1024 * 1024):
    """Compute flatten(x) @ w with the matmul tiled on the MXU.

    x: (B, ...) activation batch, w: (F, N) weight with F = prod(x.shape[1:]).
    Returns (B, N) in x.dtype.
    """
    B = int(x.shape[0])
    F = 1
    for s in x.shape[1:]:
        F *= int(s)
    assert int(w.shape[0]) == F, "weight rows must match flattened feature count"
    N = int(w.shape[1])
    itemsize = jnp.dtype(x.dtype).itemsize

    # Metadata-only flatten; feeds the kernel as a (B, F) slab.
    x2 = jnp.reshape(x, (B, F))

    # Dtype-aware sublane multiple: 8 rows for 32-bit, 16 for bf16, 32 for int8.
    sub = 8 * max(1, 4 // itemsize)

    # Batch tile (parallel grid axis).  Full-dim block is always legal, so a
    # tiny / odd batch just becomes a single row-block.
    tile_m = B
    if B % sub == 0:
        for cand in (512, 256, 128, 64, 32, 16, 8):
            if cand % sub == 0 and B % cand == 0 and cand * N * 4 <= block_bytes_max:
                tile_m = cand
                break

    # Reduction tile along the flattened feature axis (lane-aligned, <= ~2 MiB
    # per block so double-buffered in+out stays VMEM-safe on all generations).
    tile_k = F  # full-dim block is always legal (fallback for odd F)
    for cand in (2048, 1024, 512, 256, 128):
        if F % cand == 0 and (tile_m * cand + cand * N) * itemsize <= block_bytes_max:
            tile_k = cand
            break

    grid = (B // tile_m, F // tile_k)

    return pl.pallas_call(
        _flatten_linear_kernel,
        out_shape=jax.ShapeDtypeStruct((B, N), x.dtype),
        grid=grid,
        in_specs=[
            pl.BlockSpec((tile_m, tile_k), lambda m, k: (m, k)),
            pl.BlockSpec((tile_k, N), lambda m, k: (k, 0)),
        ],
        out_specs=pl.BlockSpec((tile_m, N), lambda m, k: (m, 0)),
        scratch_shapes=[pltpu.VMEM((tile_m, N), jnp.float32)],
        compiler_params=pltpu.CompilerParams(
            # batch tiles independent -> shard across v7x's two TensorCores;
            # reduction axis carries the accumulator -> arbitrary.
            dimension_semantics=("parallel", "arbitrary"),
        ),
        cost_estimate=pl.CostEstimate(
            flops=2 * B * F * N,
            transcendentals=0,
            bytes_accessed=(B * F + F * N + B * N) * itemsize,
        ),
    )(x2, w)


# ----------------------------------------------------------------------------
# JAX/Python port of the base classes (shape bookkeeping reproduced exactly).
# ----------------------------------------------------------------------------
class ModelBaseClass:
    """Base class for all ModalityNets and FusionModels (JAX/Pallas port)."""

    def __init__(self):
        self.device = jax.default_backend()  # informational only

    def calculate_features_from_sample_batch(self, sample_batch):
        self.num_flat_output_features = self.__get_num_flat_output_features(sample_batch)
        self.shape_output_features = self.__get_shape_output_features(sample_batch)

    def num_flat_features(self, x):
        size = x.shape[1:]
        num_features = 1
        for s in size:
            num_features *= s
        return int(num_features)

    def get_num_flat_output_features(self):
        return self.num_flat_output_features

    def __get_num_flat_output_features(self, sample_batch):
        x = self.forward(sample_batch)
        return int(self.num_flat_features(x))

    def get_shape_output_features(self):
        return self.shape_output_features

    def __get_shape_output_features(self, sample_batch):
        x = self.forward(sample_batch)
        return x.shape[1:]


class ModalityNetBaseClass(ModelBaseClass):
    """Base class for all modality nets (JAX/Pallas port)."""

    def __init__(self, sensor, modality_net_config_dict):
        super().__init__()
        self.sensor = sensor
        self.modality_net_config_dict = modality_net_config_dict

    def forward(self, data_dict):
        # Exact semantics: the base-class forward must not be callable.
        # TODO(synk): abstract forward() has no kernel equivalent by design.
        raise RuntimeError(
            "Method forward() of ModalityNetBaseClass shall not be called which means:"
            "\n\t\t1. Instance of ModalityNetBaseClass can't be used for training, ..."
            "\n\t\t2. forward() method must be overwritten by subclass"
        )

    def confirm_input_is_an_image(self, sample_batch):
        if len(sample_batch[self.sensor].shape) != 4:
            raise TypeError(
                f"This modality net is not compatible with input of sensor {self.sensor}, "
                f"as images with additional batch dimension are expected (batch, channels, x, y) as input!"
            )

    def confirm_input_is_timeseries_data(self, sample_batch):
        if len(sample_batch[self.sensor].shape) != 3:
            raise TypeError(
                f"This modality net is not compatible with input of sensor {self.sensor}, "
                f"as timeseries data with additional batch dimension is expected "
                f"(batch, channels, data points) as input!"
            )


if __name__ == "__main__":
    key = jax.random.PRNGKey(0)
    # NCHW image batch, small shapes: batch=2, channels=4, x=16, y=16.
    B, C, H, W = 2, 4, 16, 16
    N = 128  # lane-dense hidden width for the fused first-linear demo
    kx, kw = jax.random.split(key)
    x = jax.random.normal(kx, (B, C, H, W), dtype=jnp.float32)
    F = C * H * W
    w = jax.random.normal(kw, (F, N), dtype=jnp.float32) / jnp.sqrt(float(F))
    sample_batch = {"camera": x}

    net = ModalityNetBaseClass(sensor="camera", modality_net_config_dict={})

    # 1) Shape-compatibility checks (exact base-class semantics).
    net.confirm_input_is_an_image(sample_batch)          # must pass (4-D)
    try:
        net.confirm_input_is_timeseries_data(sample_batch)
        raise AssertionError("expected TypeError for non-timeseries input")
    except TypeError:
        pass

    # 2) Base-class forward() must raise (abstract).
    try:
        net.forward(sample_batch)
        raise AssertionError("expected RuntimeError from base-class forward()")
    except RuntimeError:
        pass

    # 3) Flatten / num_flat_features bookkeeping: pure metadata reshape (free,
    #    no kernel launched per review feedback).
    flat = flatten_features(sample_batch[net.sensor])
    n_flat = net.num_flat_features(sample_batch[net.sensor])
    assert n_flat == F
    assert flat.shape == (B, n_flat)
    assert bool(jnp.array_equal(flat, jnp.reshape(x, (B, F))))

    # 4) Fused flatten + first-linear Pallas kernel (the data path a subclass
    #    would actually run): MXU matmul over the flattened slab.
    out = flatten_linear_pallas(x, w)
    out = jax.block_until_ready(out)
    assert out.shape == (B, N)
    assert out.dtype == jnp.float32

    ref = jnp.dot(jnp.reshape(x, (B, F)), w, preferred_element_type=jnp.float32)
    assert bool(jnp.allclose(out, ref, atol=1e-2, rtol=1e-2))

    print("KERNEL_OK")
</pallas_src>

<mosaic_0001>
module attributes {stable_mosaic.version = 11 : i64} {
  func.func @_flatten_linear_kernel(%arg0: i32, %arg1: i32, %arg2: memref<2x1024xf32, #tpu.memory_space<vmem>>, %arg3: memref<1024x128xf32, #tpu.memory_space<vmem>>, %arg4: memref<2x128xf32, #tpu.memory_space<vmem>>, %arg5: memref<2x128xf32, #tpu.memory_space<vmem>>) attributes {dimension_semantics = [#tpu.dimension_semantics<parallel>, #tpu.dimension_semantics<arbitrary>], iteration_bounds = array<i64: 1, 1>, scalar_prefetch = 0 : i64, scratch_operands = 1 : i64, tpu.core_type = #tpu.core_type<tc>, window_params = [{transform_indices = @transform_0, window_bounds = array<i64: 2, 1024>}, {transform_indices = @transform_1, window_bounds = array<i64: 1024, 128>}, {transform_indices = @transform_2, window_bounds = array<i64: 2, 128>}]} {
    %c0_i32 = arith.constant 0 : i32
    %0 = arith.cmpi eq, %arg1, %c0_i32 : i32
    %1 = arith.extui %0 : i1 to i32
    %c0_i32_0 = arith.constant 0 : i32
    %2 = arith.cmpi ne, %1, %c0_i32_0 : i32
    scf.if %2 {
      %cst_10 = arith.constant 0.000000e+00 : f32
      %12 = vector.broadcast %cst_10 : f32 to vector<2x128xf32>
      %c0_11 = arith.constant 0 : index
      %c0_12 = arith.constant 0 : index
      %13 = vector.load %arg5[%c0_11, %c0_12] : memref<2x128xf32, #tpu.memory_space<vmem>>, vector<2x128xf32>
      tpu.vector_store %arg5[%c0_11, %c0_12], %12 {strides = array<i32>} : memref<2x128xf32, #tpu.memory_space<vmem>>, vector<2x128xf32>,
    } else {
    }
    %c0 = arith.constant 0 : index
    %c0_1 = arith.constant 0 : index
    %3 = vector.load %arg5[%c0, %c0_1] : memref<2x128xf32, #tpu.memory_space<vmem>>, vector<2x128xf32>
    %c0_2 = arith.constant 0 : index
    %c0_3 = arith.constant 0 : index
    %4 = vector.load %arg2[%c0_2, %c0_3] : memref<2x1024xf32, #tpu.memory_space<vmem>>, vector<2x1024xf32>
    %c0_4 = arith.constant 0 : index
    %c0_5 = arith.constant 0 : index
    %5 = vector.load %arg3[%c0_4, %c0_5] : memref<1024x128xf32, #tpu.memory_space<vmem>>, vector<1024x128xf32>
    %cst = arith.constant dense<0.000000e+00> : vector<2x128xf32>
    %6 = tpu.matmul %4, %5, %cst {dimension_numbers = #tpu.dot_dimension_numbers<[1], [0], [0], [1], [0, 0, 1, 1], [], []>} : vector<2x1024xf32>, vector<1024x128xf32>, vector<2x128xf32> -> vector<2x128xf32>
    %7 = arith.addf %3, %6 : vector<2x128xf32>
    %c0_6 = arith.constant 0 : index
    %c0_7 = arith.constant 0 : index
    %8 = vector.load %arg5[%c0_6, %c0_7] : memref<2x128xf32, #tpu.memory_space<vmem>>, vector<2x128xf32>
    tpu.vector_store %arg5[%c0_6, %c0_7], %7 {strides = array<i32>} : memref<2x128xf32, #tpu.memory_space<vmem>>, vector<2x128xf32>,
    %c0_i32_8 = arith.constant 0 : i32
    %9 = arith.cmpi eq, %arg1, %c0_i32_8 : i32
    %10 = arith.extui %9 : i1 to i32
    %c0_i32_9 = arith.constant 0 : i32
    %11 = arith.cmpi ne, %10, %c0_i32_9 : i32
    scf.if %11 {
      %c0_10 = arith.constant 0 : index
      %c0_11 = arith.constant 0 : index
      %12 = vector.load %arg5[%c0_10, %c0_11] : memref<2x128xf32, #tpu.memory_space<vmem>>, vector<2x128xf32>
      %c0_12 = arith.constant 0 : index
      %c0_13 = arith.constant 0 : index
      %13 = vector.load %arg4[%c0_12, %c0_13] : memref<2x128xf32, #tpu.memory_space<vmem>>, vector<2x128xf32>
      tpu.vector_store %arg4[%c0_12, %c0_13], %12 {strides = array<i32>} : memref<2x128xf32, #tpu.memory_space<vmem>>, vector<2x128xf32>,
    } else {
    }
    return
  }
  func.func @transform_0(%arg0: i32, %arg1: i32) -> (i32, i32) {
    %c0_i32 = arith.constant 0 : i32
    return %arg0, %arg1 : i32, i32
  }
  func.func @transform_1(%arg0: i32, %arg1: i32) -> (i32, i32) {
    %c0_i32 = arith.constant 0 : i32
    %c0_i32_0 = arith.constant 0 : i32
    return %arg1, %c0_i32 : i32, i32
  }
  func.func @transform_2(%arg0: i32, %arg1: i32) -> (i32, i32) {
    %c0_i32 = arith.constant 0 : i32
    %c0_i32_0 = arith.constant 0 : i32
    return %arg0, %c0_i32 : i32, i32
  }
}

</mosaic_0001>

<bundles_post_ra>
// kernel: tpu_custom_call.1
= control target key start
LH: loop header
LB: loop body
LE: loop exit
PB: predicated region body
PF: predicated region fallthrough
CT: control target
= control target key end

     0   :  { %7 = vsyncpa [#allocation4], 0  ;;  %s773_s0 = inlined_call_operand.hbm [shape: f32[2,1024], index: 0, kind: input, shape index: {}]   ;;  %s774_s1 = inlined_call_operand.hbm [shape: f32[1024,128], index: 1, kind: input, shape index: {}]   ;;  %s775_s2 = inlined_call_operand.hbm [shape: f32[2,128], index: 2, kind: output, shape index: {}]  }
   0x1   :  { %8 = vsyncpa [#allocation7], 0 }
   0x2   :  { %9 = vsyncpa [#allocation5], 0  ;;  %s736_s9 = smov [#allocation3]   ;;  %s737_s11 = smov [#allocation6]  }
   0x3   :  { %s16_s10 = sshll.u32 %s736_s9, 4  ;;  %s25_s12 = sshll.u32 %s737_s11, 4  ;;  %s17_s10 = int_to_ptr.vmem [resolvable:$true] %s16_s10  ;;  %s26_s12 = int_to_ptr.vmem [resolvable:$true] %s25_s12 }
   0x4   :  { %s678_s13 = scalar_lea.vmem %s17_s10, 256  ;;  %p683_p1 = scmp.lt.s32.totalorder %s17_s10, %s17_s10 }
   0x5   :  { %p679_p0 = scmp.ne.s32.totalorder %s17_s10, %s678_s13  ;;  %p684_p2 = scmp.lt.s32.totalorder %s678_s13, %s678_s13 }
   0x7   :  { %p685_p3 = por %p684_p2, %p683_p1 }
   0x9   :  { %p686_p4 = pnand %p685_p3, %p679_p0 }
   0xb   :  { %689 = shalt.err (!%p686_p4)
}
   0xc   :  { %19 = dma.hbm_to_vmem [thread:$0]  %s773_s0, 256, %s17_s10, [#allocation4]  }
   0xd   :  { %s698_s16 = scalar_lea.vmem %s26_s12, 16384  ;;  %p703_p6 = scmp.lt.s32.totalorder %s26_s12, %s26_s12 }
   0xe   :  { %p699_p5 = scmp.ne.s32.totalorder %s26_s12, %s698_s16  ;;  %p704_p7 = scmp.lt.s32.totalorder %s698_s16, %s698_s16 }
  0x10   :  { %p705_p8 = por %p704_p7, %p703_p6 }
  0x12   :  { %p706_p9 = pnand %p705_p8, %p699_p5 }
  0x14   :  { %709 = shalt.err (!%p706_p9)
}
  0x15   :  { %s738_s17 = smov 128   ;;  %s739_s18 = smov 8  }
  0x16   :  { %31 = dma.hbm_to_vmem [thread:$0]  %s774_s1, 16384, %s26_s12, [#allocation7], %s738_s17, %s738_s17, %s739_s18  }
  0x17   :  { %730 = dma.done.wait [#allocation4], 256  }
  0x18   :  { %731 = vsyncadd [#allocation4], 4294967040 }
  0x19   :  { %732 = dma.done.wait [#allocation7], 16384  }
  0x1a   :  { %733 = vsyncadd [#allocation7], 4294950912  ;;  %v77_v0 = vld [vmem:[#allocation6 + $0xf8] sm:$0xff]  ;;  %v76_v4 = vld [vmem:[#allocation6 + $0xf0] sm:$0xff]  ;;  %v740_v30 = vmov 1983009808   ;;  %v180_v32 = vlaneseq }
  0x1b   :  { %v109_v1 = vld [vmem:[#allocation6 + $0x1f8] sm:$0xff]  ;;  %521 = vmatprep.subr.mxu0 %v77_v0  ;;  %v108_v5 = vld [vmem:[#allocation6 + $0x1f0] sm:$0xff]  ;;  %v75_v8 = vld [vmem:[#allocation6 + $0xe8] sm:$0xff]  ;;  %v178_v31 = vunpack.c.l.s4 %v740_v30  ;;  %s742_s0 = smov [#allocation8]  }
  0x1c   :  { %v61_v2 = vld [vmem:[#allocation6 + $0x78] sm:$0xff]  ;;  %556 = vmatprep.subr.mxu1 %v109_v1  ;;  %v60_v6 = vld [vmem:[#allocation6 + $0x70] sm:$0xff]  ;;  %v107_v9 = vld [vmem:[#allocation6 + $0x1e8] sm:$0xff]  ;;  %v181_v42 = vshrl.u32 %v180_v32, 7  ;;  %s511_s1 = sshll.u32 %s742_s0, 4  ;;  %s512_s1 = int_to_ptr.vmem [resolvable:$true] %s511_s1 }
  0x1d   :  { %v93_v3 = vld [vmem:[#allocation6 + $0x178] sm:$0xff]  ;;  %522 = vmatpush3.msra.mxu0 %v61_v2  ;;  %v92_v7 = vld [vmem:[#allocation6 + $0x170] sm:$0xff]  ;;  %v59_v10 = vld [vmem:[#allocation6 + $0x68] sm:$0xff]  ;;  %v179_v41 = vunpack.c.0.s8 %v178_v31  ;;  %s710_s21 = scalar_lea.vmem %s512_s1, 32  ;;  %p715_p11 = scmp.lt.s32.totalorder %s512_s1, %s512_s1 }
  0x1e   :  { %557 = vmatpush3.msra.mxu1 %v93_v3  ;;  %523 = vmatprep.subr.mxu0 %v76_v4  ;;  %v91_v11 = vld [vmem:[#allocation6 + $0x168] sm:$0xff]  ;;  %v74_v12 = vld [vmem:[#allocation6 + $0xe0] sm:$0xff]  ;;  %v73_v16 = vld [vmem:[#allocation6 + $0xd8] sm:$0xff]  ;;  %p711_p10 = scmp.ne.s32.totalorder %s512_s1, %s710_s21  ;;  %p716_p12 = scmp.lt.s32.totalorder %s710_s21, %s710_s21 }
  0x1f   :  { %558 = vmatprep.subr.mxu1 %v108_v5  ;;  %524 = vmatpush3.msra.mxu0 %v60_v6  ;;  %v106_v13 = vld [vmem:[#allocation6 + $0x1e0] sm:$0xff]  ;;  %v105_v17 = vld [vmem:[#allocation6 + $0x1d8] sm:$0xff]  ;;  %v72_v20 = vld [vmem:[#allocation6 + $0xd0] sm:$0xff]  ;;  %v764_v51 = vsub.s32 %v179_v41, %v181_v42 }
  0x20   :  { %559 = vmatpush3.msra.mxu1 %v92_v7  ;;  %525 = vmatprep.subr.mxu0 %v75_v8  ;;  %v58_v14 = vld [vmem:[#allocation6 + $0x60] sm:$0xff]  ;;  %v57_v18 = vld [vmem:[#allocation6 + $0x58] sm:$0xff]  ;;  %v104_v21 = vld [vmem:[#allocation6 + $0x1d0] sm:$0xff]  ;;  %p717_p13 = por %p716_p12, %p715_p11 }
  0x21   :  { %560 = vmatprep.subr.mxu1 %v107_v9  ;;  %v90_v15 = vld [vmem:[#allocation6 + $0x160] sm:$0xff]  ;;  %526 = vmatpush3.msra.mxu0 %v59_v10  ;;  %v89_v19 = vld [vmem:[#allocation6 + $0x158] sm:$0xff]  ;;  %v56_v22 = vld [vmem:[#allocation6 + $0x50] sm:$0xff] }
  0x22   :  { %561 = vmatpush3.msra.mxu1 %v91_v11  ;;  %527 = vmatprep.subr.mxu0 %v74_v12  ;;  %v88_v23 = vld [vmem:[#allocation6 + $0x150] sm:$0xff]  ;;  %v71_v24 = vld [vmem:[#allocation6 + $0xc8] sm:$0xff]  ;;  %v70_v28 = vld [vmem:[#allocation6 + $0xc0] sm:$0xff]  ;;  %p718_p0 = pnand %p717_p13, %p711_p10 }
  0x23   :  { %562 = vmatprep.subr.mxu1 %v106_v13  ;;  %528 = vmatpush3.msra.mxu0 %v58_v14  ;;  %v103_v25 = vld [vmem:[#allocation6 + $0x1c8] sm:$0xff]  ;;  %v102_v29 = vld [vmem:[#allocation6 + $0x1c0] sm:$0xff]  ;;  %v69_v35 = vld [vmem:[#allocation6 + $0xb8] sm:$0xff] }
  0x24   :  { %563 = vmatpush3.msra.mxu1 %v90_v15  ;;  %529 = vmatprep.subr.mxu0 %v73_v16  ;;  %v55_v26 = vld [vmem:[#allocation6 + $0x48] sm:$0xff]  ;;  %v54_v33 = vld [vmem:[#allocation6 + $0x40] sm:$0xff]  ;;  %v101_v36 = vld [vmem:[#allocation6 + $0x1b8] sm:$0xff] }
  0x25   :  { %564 = vmatprep.subr.mxu1 %v105_v17  ;;  %530 = vmatpush3.msra.mxu0 %v57_v18  ;;  %v87_v27 = vld [vmem:[#allocation6 + $0x148] sm:$0xff]  ;;  %v86_v34 = vld [vmem:[#allocation6 + $0x140] sm:$0xff]  ;;  %v53_v37 = vld [vmem:[#allocation6 + $0x38] sm:$0xff] }
  0x26   :  { %565 = vmatpush3.msra.mxu1 %v89_v19  ;;  %531 = vmatprep.subr.mxu0 %v72_v20  ;;  %v85_v38 = vld [vmem:[#allocation6 + $0x138] sm:$0xff]  ;;  %v68_v39 = vld [vmem:[#allocation6 + $0xb0] sm:$0xff]  ;;  %v67_v45 = vld [vmem:[#allocation6 + $0xa8] sm:$0xff] }
  0x27   :  { %566 = vmatprep.subr.mxu1 %v104_v21  ;;  %532 = vmatpush3.msra.mxu0 %v56_v22  ;;  %v100_v40 = vld [vmem:[#allocation6 + $0x1b0] sm:$0xff]  ;;  %v99_v46 = vld [vmem:[#allocation6 + $0x1a8] sm:$0xff]  ;;  %v66_v49 = vld [vmem:[#allocation6 + $0xa0] sm:$0xff] }
  0x28   :  { %567 = vmatpush3.msra.mxu1 %v88_v23  ;;  %533 = vmatprep.subr.mxu0 %v71_v24  ;;  %v52_v43 = vld [vmem:[#allocation6 + $0x30] sm:$0xff]  ;;  %v51_v47 = vld [vmem:[#allocation6 + $0x28] sm:$0xff]  ;;  %v98_v50 = vld [vmem:[#allocation6 + $0x1a0] sm:$0xff] }
  0x29   :  { %568 = vmatprep.subr.mxu1 %v103_v25  ;;  %534 = vmatpush3.msra.mxu0 %v55_v26  ;;  %v84_v44 = vld [vmem:[#allocation6 + $0x130] sm:$0xff]  ;;  %v83_v48 = vld [vmem:[#allocation6 + $0x128] sm:$0xff]  ;;  %v50_v52 = vld [vmem:[#allocation6 + $0x20] sm:$0xff] }
  0x2a   :  { %569 = vmatpush3.msra.mxu1 %v87_v27  ;;  %535 = vmatprep.subr.mxu0 %v70_v28  ;;  %v82_v53 = vld [vmem:[#allocation6 + $0x120] sm:$0xff]  ;;  %v44_v54 = vld [vmem:[#allocation3] sm:$0xff]  ;;  %v65_v55 = vld [vmem:[#allocation6 + $0x98] sm:$0xff] }
  0x2b   :  { %570 = vmatprep.subr.mxu1 %v102_v29  ;;  %536 = vmatpush3.msra.mxu0 %v54_v33  ;;  %v97_v56 = vld [vmem:[#allocation6 + $0x198] sm:$0xff]  ;;  %v176_v57 = vcombine.high %v44_v54, %v44_v54  ;;  %v64_v60 = vld [vmem:[#allocation6 + $0x90] sm:$0xff]  ;;  %v183_v62 = vrot.slane %v44_v54, %v764_v51  ;;  %v63_v2 = vld [vmem:[#allocation6 + $0x88] sm:$0xff] }
  0x2c   :  { %571 = vmatpush3.msra.mxu1 %v86_v34  ;;  %537 = vmatprep.subr.mxu0 %v69_v35  ;;  %v49_v58 = vld [vmem:[#allocation6 + $0x18] sm:$0xff]  ;;  %v96_v61 = vld [vmem:[#allocation6 + $0x190] sm:$0xff]  ;;  %v95_v3 = vld [vmem:[#allocation6 + $0x188] sm:$0xff] }
  0x2d   :  { %572 = vmatprep.subr.mxu1 %v101_v36  ;;  %538 = vmatpush3.msra.mxu0 %v53_v37  ;;  %v81_v59 = vld [vmem:[#allocation6 + $0x118] sm:$0xff]  ;;  %v48_v63 = vld [vmem:[#allocation6 + $0x10] sm:$0xff]  ;;  %v190_v1 = vrot.slane %v176_v57, %v764_v51  ;;  %v47_v4 = vld [vmem:[#allocation6 + $0x8] sm:$0xff]  ;;  %v191_v8 = vcombine.high %v183_v62, %v183_v62 }
  0x2e   :  { %573 = vmatpush3.msra.mxu1 %v85_v38  ;;  %539 = vmatprep.subr.mxu0 %v68_v39  ;;  %v80_v0 = vld [vmem:[#allocation6 + $0x110] sm:$0xff]  ;;  %v79_v5 = vld [vmem:[#allocation6 + $0x108] sm:$0xff]  ;;  %v62_v6 = vld [vmem:[#allocation6 + $0x80] sm:$0xff] }
  0x2f   :  { %574 = vmatprep.subr.mxu1 %v100_v40  ;;  %540 = vmatpush3.msra.mxu0 %v52_v43  ;;  %v94_v7 = vld [vmem:[#allocation6 + $0x180] sm:$0xff]  ;;  %v192_v10 = vcombine.high %v190_v1, %v190_v1  ;;  %v141_v12 = vld [vmem:[#allocation6 + $0x2f8] sm:$0xff]  ;;  %v140_v16 = vld [vmem:[#allocation6 + $0x2f0] sm:$0xff] }
  0x30   :  { %575 = vmatpush3.msra.mxu1 %v84_v44  ;;  %541 = vmatprep.subr.mxu0 %v67_v45  ;;  %v46_v9 = vld [vmem:[#allocation6] sm:$0xff]  ;;  %v173_v13 = vld [vmem:[#allocation6 + $0x3f8] sm:$0xff]  ;;  %v172_v17 = vld [vmem:[#allocation6 + $0x3f0] sm:$0xff] }
  0x31   :  { %576 = vmatprep.subr.mxu1 %v99_v46  ;;  %542 = vmatpush3.msra.mxu0 %v51_v47  ;;  %v78_v11 = vld [vmem:[#allocation6 + $0x100] sm:$0xff]  ;;  %v125_v14 = vld [vmem:[#allocation6 + $0x278] sm:$0xff]  ;;  %v124_v18 = vld [vmem:[#allocation6 + $0x270] sm:$0xff] }
  0x32   :  { %577 = vmatpush3.msra.mxu1 %v83_v48  ;;  %543 = vmatprep.subr.mxu0 %v66_v49  ;;  %v157_v15 = vld [vmem:[#allocation6 + $0x378] sm:$0xff]  ;;  %v156_v19 = vld [vmem:[#allocation6 + $0x370] sm:$0xff]  ;;  %v139_v20 = vld [vmem:[#allocation6 + $0x2e8] sm:$0xff] }
  0x33   :  { %578 = vmatprep.subr.mxu1 %v98_v50  ;;  %544 = vmatpush3.msra.mxu0 %v50_v52  ;;  %v171_v21 = vld [vmem:[#allocation6 + $0x3e8] sm:$0xff]  ;;  %v138_v24 = vld [vmem:[#allocation6 + $0x2e0] sm:$0xff]  ;;  %v137_v28 = vld [vmem:[#allocation6 + $0x2d8] sm:$0xff] }
  0x34   :  { %579 = vmatpush3.msra.mxu1 %v82_v53  ;;  %545 = vmatprep.subr.mxu0 %v65_v55  ;;  %v123_v22 = vld [vmem:[#allocation6 + $0x268] sm:$0xff]  ;;  %v170_v25 = vld [vmem:[#allocation6 + $0x3e0] sm:$0xff]  ;;  %v169_v29 = vld [vmem:[#allocation6 + $0x3d8] sm:$0xff] }
  0x35   :  { %580 = vmatprep.subr.mxu1 %v97_v56  ;;  %546 = vmatpush3.msra.mxu0 %v49_v58  ;;  %v155_v23 = vld [vmem:[#allocation6 + $0x368] sm:$0xff]  ;;  %v122_v26 = vld [vmem:[#allocation6 + $0x260] sm:$0xff]  ;;  %v121_v30 = vld [vmem:[#allocation6 + $0x258] sm:$0xff] }
  0x36   :  { %581 = vmatpush3.msra.mxu1 %v81_v59  ;;  %547 = vmatprep.subr.mxu0 %v64_v60  ;;  %v154_v27 = vld [vmem:[#allocation6 + $0x360] sm:$0xff]  ;;  %v153_v31 = vld [vmem:[#allocation6 + $0x358] sm:$0xff]  ;;  %v136_v32 = vld [vmem:[#allocation6 + $0x2d0] sm:$0xff] }
  0x37   :  { %582 = vmatprep.subr.mxu1 %v96_v61  ;;  %548 = vmatpush3.msra.mxu0 %v48_v63  ;;  %v168_v33 = vld [vmem:[#allocation6 + $0x3d0] sm:$0xff]  ;;  %v135_v36 = vld [vmem:[#allocation6 + $0x2c8] sm:$0xff]  ;;  %v134_v40 = vld [vmem:[#allocation6 + $0x2c0] sm:$0xff] }
  0x38   :  { %583 = vmatpush3.msra.mxu1 %v80_v0  ;;  %549 = vmatprep.subr.mxu0 %v63_v2  ;;  %v120_v34 = vld [vmem:[#allocation6 + $0x250] sm:$0xff]  ;;  %v167_v37 = vld [vmem:[#allocation6 + $0x3c8] sm:$0xff]  ;;  %v166_v41 = vld [vmem:[#allocation6 + $0x3c0] sm:$0xff] }
  0x39   :  { %584 = vmatprep.subr.mxu1 %v95_v3  ;;  %550 = vmatpush3.msra.mxu0 %v47_v4  ;;  %v152_v35 = vld [vmem:[#allocation6 + $0x350] sm:$0xff]  ;;  %v119_v38 = vld [vmem:[#allocation6 + $0x248] sm:$0xff]  ;;  %v118_v42 = vld [vmem:[#allocation6 + $0x240] sm:$0xff] }
  0x3a   :  { %585 = vmatpush3.msra.mxu1 %v79_v5  ;;  %551 = vmatprep.subr.mxu0 %v62_v6  ;;  %v151_v39 = vld [vmem:[#allocation6 + $0x348] sm:$0xff]  ;;  %v150_v43 = vld [vmem:[#allocation6 + $0x340] sm:$0xff]  ;;  %v133_v44 = vld [vmem:[#allocation6 + $0x2b8] sm:$0xff] }
  0x3b   :  { %586 = vmatprep.subr.mxu1 %v94_v7  ;;  %552 = vmatpush3.msra.mxu0 %v46_v9  ;;  %v165_v45 = vld [vmem:[#allocation6 + $0x3b8] sm:$0xff]  ;;  %v132_v48 = vld [vmem:[#allocation6 + $0x2b0] sm:$0xff]  ;;  %v131_v53 = vld [vmem:[#allocation6 + $0x2a8] sm:$0xff] }
  0x3c   :  { %282 = vmatprep.mubr.f32.mxu0 %v191_v8  ;;  %587 = vmatpush3.msra.mxu1 %v78_v11  ;;  %v117_v46 = vld [vmem:[#allocation6 + $0x238] sm:$0xff]  ;;  %v164_v49 = vld [vmem:[#allocation6 + $0x3b0] sm:$0xff]  ;;  %v163_v54 = vld [vmem:[#allocation6 + $0x3a8] sm:$0xff] }
  0x3d   :  { %352 = vmatprep.mubr.f32.mxu1 %v192_v10  ;;  %283 = vmatmul.mubr.f32.vlgmr.msra.gmra.mxu0 %v183_v62  ;;  %v149_v47 = vld [vmem:[#allocation6 + $0x338] sm:$0xff]  ;;  %v116_v50 = vld [vmem:[#allocation6 + $0x230] sm:$0xff]  ;;  %v115_v56 = vld [vmem:[#allocation6 + $0x228] sm:$0xff] }
  0x3e   :  { %353 = vmatmul.mubr.f32.vlgmr.msra.gmra.mxu1 %v190_v1  ;;  %591 = vmatprep.subr.mxu0 %v141_v12  ;;  %v148_v52 = vld [vmem:[#allocation6 + $0x330] sm:$0xff]  ;;  %v45_v55 = vld [vmem:[#allocation3 + $0x8] sm:$0xff]  ;;  %v147_v57 = vld [vmem:[#allocation6 + $0x328] sm:$0xff] }
  0x3f   :  { %626 = vmatprep.subr.mxu1 %v173_v13  ;;  %592 = vmatpush3.msra.mxu0 %v125_v14  ;;  %v130_v58 = vld [vmem:[#allocation6 + $0x2a0] sm:$0xff]  ;;  %v193_v62 = vcombine.high %v45_v55, %v45_v55  ;;  %v129_v63 = vld [vmem:[#allocation6 + $0x298] sm:$0xff]  ;;  %v128_v3 = vld [vmem:[#allocation6 + $0x290] sm:$0xff]  ;;  %v200_v5 = vrot.slane %v45_v55, %v764_v51 }
  0x40   :  { %627 = vmatpush3.msra.mxu1 %v157_v15  ;;  %593 = vmatprep.subr.mxu0 %v140_v16  ;;  %v162_v59 = vld [vmem:[#allocation6 + $0x3a0] sm:$0xff]  ;;  %v161_v0 = vld [vmem:[#allocation6 + $0x398] sm:$0xff]  ;;  %v160_v4 = vld [vmem:[#allocation6 + $0x390] sm:$0xff] }
  0x41   :  { %628 = vmatprep.subr.mxu1 %v172_v17  ;;  %594 = vmatpush3.msra.mxu0 %v124_v18  ;;  %v114_v60 = vld [vmem:[#allocation6 + $0x220] sm:$0xff]  ;;  %v113_v1 = vld [vmem:[#allocation6 + $0x218] sm:$0xff]  ;;  %v112_v6 = vld [vmem:[#allocation6 + $0x210] sm:$0xff]  ;;  %v207_v8 = vrot.slane %v193_v62, %v764_v51  ;;  %v208_v15 = vcombine.high %v200_v5, %v200_v5  ;;  %v741_v18 = vmov 0.0  }
  0x42   :  { %629 = vmatpush3.msra.mxu1 %v156_v19  ;;  %595 = vmatprep.subr.mxu0 %v139_v20  ;;  %v146_v61 = vld [vmem:[#allocation6 + $0x320] sm:$0xff]  ;;  %v145_v2 = vld [vmem:[#allocation6 + $0x318] sm:$0xff]  ;;  %v144_v7 = vld [vmem:[#allocation6 + $0x310] sm:$0xff]  ;;  %42 = vst [vmem:[#allocation2] sm:$0x3] %v741_v18 }
  0x43   :  { %630 = vmatprep.subr.mxu1 %v171_v21  ;;  %596 = vmatpush3.msra.mxu0 %v123_v22  ;;  %v127_v9 = vld [vmem:[#allocation6 + $0x288] sm:$0xff]  ;;  %v126_v13 = vld [vmem:[#allocation6 + $0x280] sm:$0xff]  ;;  %v209_v17 = vcombine.high %v207_v8, %v207_v8 }
  0x44   :  { %631 = vmatpush3.msra.mxu1 %v155_v23  ;;  %597 = vmatprep.subr.mxu0 %v138_v24  ;;  %v159_v10 = vld [vmem:[#allocation6 + $0x388] sm:$0xff]  ;;  %v158_v14 = vld [vmem:[#allocation6 + $0x380] sm:$0xff] }
  0x45   :  { %632 = vmatprep.subr.mxu1 %v170_v25  ;;  %598 = vmatpush3.msra.mxu0 %v122_v26  ;;  %v111_v11 = vld [vmem:[#allocation6 + $0x208] sm:$0xff]  ;;  %v110_v16 = vld [vmem:[#allocation6 + $0x200] sm:$0xff] }
  0x46   :  { %633 = vmatpush3.msra.mxu1 %v154_v27  ;;  %599 = vmatprep.subr.mxu0 %v137_v28  ;;  %v143_v12 = vld [vmem:[#allocation6 + $0x308] sm:$0xff]  ;;  %v142_v51 = vld [vmem:[#allocation6 + $0x300] sm:$0xff] }
  0x47   :  { %634 = vmatprep.subr.mxu1 %v169_v29  ;;  %600 = vmatpush3.msra.mxu0 %v121_v30 }
  0x48   :  { %635 = vmatpush3.msra.mxu1 %v153_v31  ;;  %601 = vmatprep.subr.mxu0 %v136_v32 }
  0x49   :  { %636 = vmatprep.subr.mxu1 %v168_v33  ;;  %602 = vmatpush3.msra.mxu0 %v120_v34  ;;  %v43_v33 = vld [vmem:[#allocation2] sm:$0x3] }
  0x4a   :  { %637 = vmatpush3.msra.mxu1 %v152_v35  ;;  %603 = vmatprep.subr.mxu0 %v135_v36 }
  0x4b   :  { %638 = vmatprep.subr.mxu1 %v167_v37  ;;  %604 = vmatpush3.msra.mxu0 %v119_v38 }
  0x4c   :  { %639 = vmatpush3.msra.mxu1 %v151_v39  ;;  %605 = vmatprep.subr.mxu0 %v134_v40 }
  0x4d   :  { %640 = vmatprep.subr.mxu1 %v166_v41  ;;  %606 = vmatpush3.msra.mxu0 %v118_v42 }
  0x4e   :  { %641 = vmatpush3.msra.mxu1 %v150_v43  ;;  %607 = vmatprep.subr.mxu0 %v133_v44 }
  0x4f   :  { %642 = vmatprep.subr.mxu1 %v165_v45  ;;  %608 = vmatpush3.msra.mxu0 %v117_v46 }
  0x50   :  { %643 = vmatpush3.msra.mxu1 %v149_v47  ;;  %609 = vmatprep.subr.mxu0 %v132_v48 }
  0x51   :  { %644 = vmatprep.subr.mxu1 %v164_v49  ;;  %610 = vmatpush3.msra.mxu0 %v116_v50 }
  0x52   :  { %645 = vmatpush3.msra.mxu1 %v148_v52  ;;  %611 = vmatprep.subr.mxu0 %v131_v53 }
  0x53   :  { %646 = vmatprep.subr.mxu1 %v163_v54  ;;  %612 = vmatpush3.msra.mxu0 %v115_v56 }
  0x54   :  { %647 = vmatpush3.msra.mxu1 %v147_v57  ;;  %613 = vmatprep.subr.mxu0 %v130_v58 }
  0x55   :  { %648 = vmatprep.subr.mxu1 %v162_v59  ;;  %614 = vmatpush3.msra.mxu0 %v114_v60 }
  0x56   :  { %649 = vmatpush3.msra.mxu1 %v146_v61  ;;  %615 = vmatprep.subr.mxu0 %v129_v63 }
  0x57   :  { %650 = vmatprep.subr.mxu1 %v161_v0  ;;  %616 = vmatpush3.msra.mxu0 %v113_v1 }
  0x58   :  { %651 = vmatpush3.msra.mxu1 %v145_v2  ;;  %617 = vmatprep.subr.mxu0 %v128_v3 }
  0x59   :  { %652 = vmatprep.subr.mxu1 %v160_v4  ;;  %618 = vmatpush3.msra.mxu0 %v112_v6 }
  0x5a   :  { %653 = vmatpush3.msra.mxu1 %v144_v7  ;;  %619 = vmatprep.subr.mxu0 %v127_v9 }
  0x5b   :  { %654 = vmatprep.subr.mxu1 %v159_v10  ;;  %620 = vmatpush3.msra.mxu0 %v111_v11 }
  0x5c   :  { %655 = vmatpush3.msra.mxu1 %v143_v12  ;;  %621 = vmatprep.subr.mxu0 %v126_v13 }
  0x5d   :  { %656 = vmatprep.subr.mxu1 %v158_v14  ;;  %622 = vmatpush3.msra.mxu0 %v110_v16 }
  0x5e   :  { %422 = vmatprep.mubr.f32.mxu0 %v208_v15  ;;  %657 = vmatpush3.msra.mxu1 %v142_v51 }
  0x5f   :  { %492 = vmatprep.mubr.f32.mxu1 %v209_v17  ;;  %423 = vmatmul.mubr.f32.vlgmr.msra.gmra.mxu0 %v200_v5 }
  0x60   :  { %493 = vmatmul.mubr.f32.vlgmr.msra.gmra.mxu1 %v207_v8 }
  0xfd   :  { %v553_v19 = vpop.f32.mrf.mxu0 }
  0xfe   :  { %v588_v20 = vpop.f32.mrf.mxu1 }
  0xff   :  { %v554_v21 = vpop.f32.mrf.mxu0 }
 0x100   :  { %v589_v22 = vpop.f32.mrf.mxu1  ;;  %v555_v23 = vadd.f32 %v554_v21, %v553_v19 }
 0x101   :  { %v590_v24 = vadd.f32 %v589_v22, %v588_v20 }
 0x103   :  { %v355_v29 = vadd.f32 %v590_v24, %v555_v23 }
 0x11f   :  { %v623_v25 = vpop.f32.mrf.mxu0 }
 0x120   :  { %v658_v26 = vpop.f32.mrf.mxu1 }
 0x121   :  { %v624_v27 = vpop.f32.mrf.mxu0 }
 0x122   :  { %v659_v28 = vpop.f32.mrf.mxu1  ;;  %v625_v30 = vadd.f32 %v624_v27, %v623_v25 }
 0x123   :  { %v660_v32 = vadd.f32 %v659_v28, %v658_v26 }
 0x124   :  { %v425_v31 = vadd.f32 %v625_v30, %v355_v29 }
 0x126   :  { %v495_v34 = vadd.f32 %v660_v32, %v425_v31 }
 0x128   :  { %v498_v35 = vadd.f32 %v495_v34, %v43_v33 }
 0x12a   :  { %499 = vst [vmem:[#allocation2] sm:$0x3] %v498_v35 }
 0x131   :  { %v503_v36 = vld [vmem:[#allocation2] sm:$0x3] }
 0x132   :  { %504 = vst [vmem:[#allocation8] sm:$0x3] %v503_v36 }
 0x133   :  { %721 = shalt.err (!%p718_p0)
}
 0x134   :  { %514 = dma.vmem_to_hbm [thread:$0]  %s512_s1, 32, %s775_s2, [#allocation5]  }
 0x135   :  { %734 = dma.done.wait [#allocation5], 32  }
 0x136   :  { %735 = vsyncadd [#allocation5], 4294967264 }
 0x137   :  { %518 = vsyncpa [#allocation4], 1 }
 0x138   :  { %519 = vsyncpa [#allocation7], 1 }
 0x139   :  { %520 = vsyncpa [#allocation5], 1 }

</bundles_post_ra>
